<compile_context>
chip_gen: v7x
topology: tpu7x:2x2x1
jax: 0.10.0
libtpu: 0.0.40
codegen_flags: <defaults>
</compile_context>

<pallas_src>
import functools

import numpy as np
import jax
import jax.numpy as jnp
from jax.experimental import pallas as pl
from jax.experimental.pallas import tpu as pltpu


# ------------------------------ helpers --------------------------------------


def _ln(h, gamma, beta, eps=1e-5):
    mu = jnp.mean(h, axis=-1, keepdims=True)
    var = jnp.mean((h - mu) ** 2, axis=-1, keepdims=True)
    return (h - mu) * jax.lax.rsqrt(var + eps) * gamma + beta


def _round_up(x, m):
    return ((x + m - 1) // m) * m


def _build_slots(dst_np, n_nodes, n_edges, n_pad_nodes, sentinel):
    """Padded CSR incoming-edge slot table.

    slot[i, k] = edge id of the k-th edge whose destination is node i,
    padded with `sentinel` (which indexes an appended zero row)."""
    counts = np.bincount(dst_np, minlength=n_nodes)
    kmax = int(counts.max()) if n_edges > 0 else 1
    kslots = max(_round_up(kmax, 8), 8)                      # sublane-friendly
    slot = np.full((n_pad_nodes, kslots), sentinel, dtype=np.int32)
    order = np.argsort(dst_np, kind="stable")
    seg_start = np.zeros(n_nodes, dtype=np.int64)
    seg_start[1:] = np.cumsum(counts)[:-1]
    pos = np.arange(n_edges) - seg_start[dst_np[order]]
    slot[dst_np[order], pos] = order.astype(np.int32)
    valid = slot != sentinel
    return slot, valid, kslots


# ------------------------------ kernels --------------------------------------


def node_kv_kernel(hn_ref, wk_ref, bk_ref, wv_ref, bv_ref, k_ref, v_ref):
    """Per-node K / V projections (needed full-graph before the slot gather).
       Outputs bf16 to halve the downstream gather traffic."""
    hn = hn_ref[...].astype(jnp.bfloat16)
    k_ref[...] = (jnp.dot(hn, wk_ref[...], preferred_element_type=jnp.float32)
                  + bk_ref[...]).astype(k_ref.dtype)
    v_ref[...] = (jnp.dot(hn, wv_ref[...], preferred_element_type=jnp.float32)
                  + bv_ref[...]).astype(v_ref.dtype)


def edge_update_kernel(hd_ref, hs_ref, he_ref, ks_ref, vs_ref,
                       w1d_ref, w1s_ref, w1e_ref, b1_ref, w2_ref, b2_ref,
                       we_ref, be_ref, g_ref, bt_ref,
                       he_out_ref, ke_out_ref, ve_out_ref):
    """h_edge <- LN(h_edge + MLP([h_node[dst], h_node[src], h_edge]));
       em     <- h_edge_new @ We + be   (edge attention bias, fused);
       ke/ve  <- k[src] + em / v[src] + em  (fused, so no em HBM array)."""
    he = he_ref[...]                                         # f32 [TE, dim]
    h1 = (jnp.dot(hd_ref[...], w1d_ref[...], preferred_element_type=jnp.float32)
          + jnp.dot(hs_ref[...], w1s_ref[...], preferred_element_type=jnp.float32)
          + jnp.dot(he.astype(jnp.bfloat16), w1e_ref[...],
                    preferred_element_type=jnp.float32)
          + b1_ref[...])
    h1 = h1 * jax.nn.sigmoid(h1)                             # SiLU
    y = (jnp.dot(h1.astype(jnp.bfloat16), w2_ref[...],
                 preferred_element_type=jnp.float32) + b2_ref[...])
    he_new = _ln(he + y, g_ref[...], bt_ref[...])
    he_out_ref[...] = he_new
    em = (jnp.dot(he_new.astype(jnp.bfloat16), we_ref[...],
                  preferred_element_type=jnp.float32) + be_ref[...])
    ke_out_ref[...] = (ks_ref[...].astype(jnp.float32) + em).astype(ke_out_ref.dtype)
    ve_out_ref[...] = (vs_ref[...].astype(jnp.float32) + em).astype(ve_out_ref.dtype)


def node_attn_ff_kernel(hn_ref, ks_ref, vs_ref, valid_ref, cwm_ref,
                        wq_ref, bq_ref, hb_ref, wo_ref, bo_ref, g1_ref, bt1_ref,
                        f1_ref, c1_ref, f2_ref, c2_ref, g2_ref, bt2_ref,
                        o_ref, *, scale):
    """Fused: multi-head edge-biased attention over incoming-edge slots
       (+residual+LN), then the position-wise feed-forward (+residual+LN)."""
    hn = hn_ref[...]                                         # f32 [TN, dim]
    q = (jnp.dot(hn.astype(jnp.bfloat16), wq_ref[...],
                 preferred_element_type=jnp.float32) + bq_ref[...])
    ks = ks_ref[...].astype(jnp.float32)                     # [TN, K, dim]  k[src]+em
    vs = vs_ref[...].astype(jnp.float32)                     # [TN, K, dim]  v[src]+em
    qk = q[:, None, :] * ks                                  # [TN, K, dim]
    tn, kk, d = qk.shape
    # per-head score = sum over the head's lanes, broadcast back over them (MXU)
    s = jnp.dot(qk.reshape(tn * kk, d), hb_ref[...],
                preferred_element_type=jnp.float32).reshape(tn, kk, d) * scale
    m = jnp.max(s, axis=1, keepdims=True)                    # per-node/head shift (exact)
    p = jnp.exp(s - m)                                       # [TN, K, dim]
    valid = valid_ref[...]                                   # [TN, K, 1]  1 real / 0 pad
    cwm = cwm_ref[...]                                       # [TN, K, 1]  cutoff * valid
    den = jnp.sum(p * valid, axis=1)                         # [TN, dim]
    num = jnp.sum(p * cwm * vs, axis=1)                      # [TN, dim]
    agg = num * pl.reciprocal(jnp.maximum(den, 1e-20), approx=True)
    y = (jnp.dot(agg.astype(jnp.bfloat16), wo_ref[...],
                 preferred_element_type=jnp.float32) + bo_ref[...])
    h = _ln(hn + y, g1_ref[...], bt1_ref[...])
    h1 = (jnp.dot(h.astype(jnp.bfloat16), f1_ref[...],
                  preferred_element_type=jnp.float32) + c1_ref[...])
    h1 = h1 * jax.nn.sigmoid(h1)                             # SiLU
    y2 = (jnp.dot(h1.astype(jnp.bfloat16), f2_ref[...],
                  preferred_element_type=jnp.float32) + c2_ref[...])
    o_ref[...] = _ln(h + y2, g2_ref[...], bt2_ref[...])


# --------------------------- forward wrapper ----------------------------------

_PAR = pltpu.CompilerParams(dimension_semantics=("parallel",))


def processor_forward(params, h_node, edge_index, h_edge, edge_len, *,
                      num_heads, cutoff, node_tile=128, edge_tile=512):
    N, dim = h_node.shape
    E = h_edge.shape[0]
    ff_dim = params["layers"][0]["ff_w1"].shape[1]
    assert dim % num_heads == 0
    head_dim = dim // num_heads
    scale = 1.0 / float(head_dim) ** 0.5
    bf16 = jnp.bfloat16

    node_tile = min(node_tile, _round_up(N, 8))
    edge_tile = min(edge_tile, _round_up(E, 8))
    N_pad = _round_up(N, node_tile)
    E_pad = _round_up(E, edge_tile)

    # ----- layer-invariant graph precompute (host numpy + cheap XLA glue) -----
    dst_np = np.asarray(edge_index[0], dtype=np.int64)
    src_np = np.asarray(edge_index[1], dtype=np.int64)
    slot_np, valid_np, KS = _build_slots(dst_np, N, E, N_pad, sentinel=E_pad)
    slot_edge = jnp.asarray(slot_np)                                  # [N_pad, KS]
    valid = jnp.asarray(valid_np.astype(np.float32))[..., None]       # [N_pad, KS, 1]

    dst_pad = jnp.asarray(np.pad(dst_np, (0, E_pad - E)).astype(np.int32))
    src_pad = jnp.asarray(np.pad(src_np, (0, E_pad - E)).astype(np.int32))

    r = edge_len.reshape(E).astype(jnp.float32)
    cw = 0.5 * (jnp.cos(jnp.pi * r / cutoff) + 1.0)
    cw = jnp.where(r < cutoff, cw, 0.0)                               # cosine cutoff
    cw_pad = jnp.concatenate([cw, jnp.zeros((E_pad + 1 - E,), jnp.float32)])
    cwm = jnp.take(cw_pad, slot_edge, axis=0)[..., None] * valid      # [N_pad, KS, 1]

    # block-diagonal per-head "reduce & broadcast" matrix (lane-dense scores)
    lane = jnp.arange(dim)
    head_blk = (lane[:, None] // head_dim
                == lane[None, :] // head_dim).astype(jnp.float32)     # [dim, dim]

    hn = jnp.pad(h_node.astype(jnp.float32), ((0, N_pad - N), (0, 0)))
    he = jnp.pad(h_edge.astype(jnp.float32), ((0, E_pad - E), (0, 0)))
    zrow_b = jnp.zeros((1, dim), bf16)                                # sentinel row

    row2 = lambda i: (i, 0)
    row3 = lambda i: (i, 0, 0)
    fix2 = lambda i: (0, 0)

    for lp in params["layers"]:
        w1 = lp["edge_w1"]
        w1d = w1[0:dim].astype(bf16)
        w1s = w1[dim:2 * dim].astype(bf16)
        w1e = w1[2 * dim:3 * dim].astype(bf16)

        # --- (1) per-node K / V projections (bf16 out), tiled over nodes ---
        k, v = pl.pallas_call(
            node_kv_kernel,
            grid=(N_pad // node_tile,),
            in_specs=[
                pl.BlockSpec((node_tile, dim), row2),
                pl.BlockSpec((dim, dim), fix2),
                pl.BlockSpec((1, dim), fix2),
                pl.BlockSpec((dim, dim), fix2),
                pl.BlockSpec((1, dim), fix2),
            ],
            out_specs=(pl.BlockSpec((node_tile, dim), row2),
                       pl.BlockSpec((node_tile, dim), row2)),
            out_shape=(jax.ShapeDtypeStruct((N_pad, dim), bf16),
                       jax.ShapeDtypeStruct((N_pad, dim), bf16)),
            compiler_params=_PAR,
        )(hn, lp["wk"].astype(bf16), lp["bk"], lp["wv"].astype(bf16), lp["bv"])

        # --- O(E*dim) row gathers (XLA glue, bf16 where possible) ---
        hn_b = hn.astype(bf16)
        h_dst = jnp.take(hn_b, dst_pad, axis=0)
        h_src = jnp.take(hn_b, src_pad, axis=0)
        k_src = jnp.take(k, src_pad, axis=0)
        v_src = jnp.take(v, src_pad, axis=0)

        # --- (2) edge update + fused bias projection + k/v bias add, edge-tiled ---
        he, ke, ve = pl.pallas_call(
            edge_update_kernel,
            grid=(E_pad // edge_tile,),
            in_specs=[
                pl.BlockSpec((edge_tile, dim), row2),                 # h_dst
                pl.BlockSpec((edge_tile, dim), row2),                 # h_src
                pl.BlockSpec((edge_tile, dim), row2),                 # h_edge
                pl.BlockSpec((edge_tile, dim), row2),                 # k[src]
                pl.BlockSpec((edge_tile, dim), row2),                 # v[src]
                pl.BlockSpec((dim, ff_dim), fix2),                    # W1[dst]
                pl.BlockSpec((dim, ff_dim), fix2),                    # W1[src]
                pl.BlockSpec((dim, ff_dim), fix2),                    # W1[edge]
                pl.BlockSpec((1, ff_dim), fix2),                      # b1
                pl.BlockSpec((ff_dim, dim), fix2),                    # W2
                pl.BlockSpec((1, dim), fix2),                         # b2
                pl.BlockSpec((dim, dim), fix2),                       # We
                pl.BlockSpec((1, dim), fix2),                         # be
                pl.BlockSpec((1, dim), fix2),                         # LN gamma
                pl.BlockSpec((1, dim), fix2),                         # LN beta
            ],
            out_specs=(pl.BlockSpec((edge_tile, dim), row2),
                       pl.BlockSpec((edge_tile, dim), row2),
                       pl.BlockSpec((edge_tile, dim), row2)),
            out_shape=(jax.ShapeDtypeStruct((E_pad, dim), jnp.float32),
                       jax.ShapeDtypeStruct((E_pad, dim), bf16),
                       jax.ShapeDtypeStruct((E_pad, dim), bf16)),
            compiler_params=_PAR,
        )(h_dst, h_src, he, k_src, v_src,
          w1d, w1s, w1e, lp["edge_b1"], lp["edge_w2"].astype(bf16), lp["edge_b2"],
          lp["we"].astype(bf16), lp["be"], lp["edge_ln_g"], lp["edge_ln_b"])

        # --- gather into padded incoming-edge slots (bf16, XLA glue) ---
        k_slots = jnp.take(jnp.concatenate([ke, zrow_b], axis=0), slot_edge, axis=0)
        v_slots = jnp.take(jnp.concatenate([ve, zrow_b], axis=0), slot_edge, axis=0)

        # --- (3) fused attention + feed-forward, tiled over nodes ---
        hn = pl.pallas_call(
            functools.partial(node_attn_ff_kernel, scale=scale),
            grid=(N_pad // node_tile,),
            in_specs=[
                pl.BlockSpec((node_tile, dim), row2),                 # h_node
                pl.BlockSpec((node_tile, KS, dim), row3),             # k slots
                pl.BlockSpec((node_tile, KS, dim), row3),             # v slots
                pl.BlockSpec((node_tile, KS, 1), row3),               # valid mask
                pl.BlockSpec((node_tile, KS, 1), row3),               # cutoff weights
                pl.BlockSpec((dim, dim), fix2),                       # Wq
                pl.BlockSpec((1, dim), fix2),                         # bq
                pl.BlockSpec((dim, dim), fix2),                       # head block matrix
                pl.BlockSpec((dim, dim), fix2),                       # Wo
                pl.BlockSpec((1, dim), fix2),                         # bo
                pl.BlockSpec((1, dim), fix2),                         # LN1 gamma
                pl.BlockSpec((1, dim), fix2),                         # LN1 beta
                pl.BlockSpec((dim, ff_dim), fix2),                    # FF W1
                pl.BlockSpec((1, ff_dim), fix2),                      # FF b1
                pl.BlockSpec((ff_dim, dim), fix2),                    # FF W2
                pl.BlockSpec((1, dim), fix2),                         # FF b2
                pl.BlockSpec((1, dim), fix2),                         # LN2 gamma
                pl.BlockSpec((1, dim), fix2),                         # LN2 beta
            ],
            out_specs=pl.BlockSpec((node_tile, dim), row2),
            out_shape=jax.ShapeDtypeStruct((N_pad, dim), jnp.float32),
            compiler_params=_PAR,
        )(hn, k_slots, v_slots, valid, cwm,
          lp["wq"].astype(bf16), lp["bq"], head_blk,
          lp["wo"].astype(bf16), lp["bo"], lp["ln1_g"], lp["ln1_b"],
          lp["ff_w1"].astype(bf16), lp["ff_b1"],
          lp["ff_w2"].astype(bf16), lp["ff_b2"],
          lp["ln2_g"], lp["ln2_b"])

    return hn[:N], he[:E]


# ------------------------------ params ---------------------------------------


def _linear_init(key, fan_in, fan_out):
    # PyTorch nn.Linear default: U(-1/sqrt(fan_in), 1/sqrt(fan_in))
    kw, kb = jax.random.split(key)
    bound = 1.0 / (fan_in ** 0.5)
    w = jax.random.uniform(kw, (fan_in, fan_out), jnp.float32, -bound, bound)
    b = jax.random.uniform(kb, (1, fan_out), jnp.float32, -bound, bound)
    return w, b


def init_params(key, dim, ff_dim, num_convs):
    ones = jnp.ones((1, dim), jnp.float32)
    zeros = jnp.zeros((1, dim), jnp.float32)
    layers = []
    for _ in range(num_convs):
        key, *ks = jax.random.split(key, 10)
        ew1, eb1 = _linear_init(ks[0], 3 * dim, ff_dim)
        ew2, eb2 = _linear_init(ks[1], ff_dim, dim)
        wq, bq = _linear_init(ks[2], dim, dim)
        wk, bk = _linear_init(ks[3], dim, dim)
        wv, bv = _linear_init(ks[4], dim, dim)
        we, be = _linear_init(ks[5], dim, dim)
        wo, bo = _linear_init(ks[6], dim, dim)
        fw1, fb1 = _linear_init(ks[7], dim, ff_dim)
        fw2, fb2 = _linear_init(ks[8], ff_dim, dim)
        layers.append(dict(
            edge_w1=ew1, edge_b1=eb1, edge_w2=ew2, edge_b2=eb2,
            edge_ln_g=ones, edge_ln_b=zeros,
            wq=wq, bq=bq, wk=wk, bk=bk, wv=wv, bv=bv,
            we=we, be=be, wo=wo, bo=bo,
            ln1_g=ones, ln1_b=zeros,
            ff_w1=fw1, ff_b1=fb1, ff_w2=fw2, ff_b2=fb2,
            ln2_g=ones, ln2_b=zeros))
    return {"layers": layers}


# -------------------------------- demo ----------------------------------------


if __name__ == "__main__":
    dim, ff_dim, num_convs, num_heads, cutoff = 128, 256, 2, 4, 3.0
    N, deg = 256, 8
    E = N * deg

    key = jax.random.PRNGKey(0)
    k1, k2, k3, kp = jax.random.split(key, 4)
    h_node = jax.random.normal(k1, (N, dim), jnp.float32)
    h_edge = jax.random.normal(k2, (E, dim), jnp.float32)

    # deg-regular ring graph: every node receives exactly `deg` edges.
    dst = jnp.repeat(jnp.arange(N, dtype=jnp.int32), deg)
    offs = jnp.tile(jnp.arange(1, deg + 1, dtype=jnp.int32), N)
    src = (dst + offs) % N
    edge_index = jnp.stack([dst, src], axis=0)                 # [2, E]
    edge_len = jax.random.uniform(k3, (E,), jnp.float32, 0.5, 2.5)

    params = init_params(kp, dim, ff_dim, num_convs)

    h_node_out, h_edge_out = processor_forward(
        params, h_node, edge_index, h_edge, edge_len,
        num_heads=num_heads, cutoff=cutoff)
    jax.block_until_ready((h_node_out, h_edge_out))

    assert h_node_out.shape == (N, dim) and h_edge_out.shape == (E, dim)
    assert bool(jnp.all(jnp.isfinite(h_node_out))) and bool(jnp.all(jnp.isfinite(h_edge_out)))
    print("KERNEL_OK")
</pallas_src>

<mosaic_0001>
module attributes {stable_mosaic.version = 11 : i64} {
  func.func @node_kv_kernel(%arg0: i32, %arg1: memref<128x128xf32, #tpu.memory_space<vmem>>, %arg2: memref<128x128xbf16, #tpu.memory_space<vmem>>, %arg3: memref<1x128xf32, #tpu.memory_space<vmem>>, %arg4: memref<128x128xbf16, #tpu.memory_space<vmem>>, %arg5: memref<1x128xf32, #tpu.memory_space<vmem>>, %arg6: memref<128x128xbf16, #tpu.memory_space<vmem>>, %arg7: memref<128x128xbf16, #tpu.memory_space<vmem>>) attributes {dimension_semantics = [#tpu.dimension_semantics<parallel>], iteration_bounds = array<i64: 2>, scalar_prefetch = 0 : i64, scratch_operands = 0 : i64, tpu.core_type = #tpu.core_type<tc>, window_params = [{transform_indices = @transform_0, window_bounds = array<i64: 128, 128>}, {pipeline_mode = #tpu.pipeline_mode<synchronous>, transform_indices = @transform_1, window_bounds = array<i64: 128, 128>}, {pipeline_mode = #tpu.pipeline_mode<synchronous>, transform_indices = @transform_2, window_bounds = array<i64: 1, 128>}, {pipeline_mode = #tpu.pipeline_mode<synchronous>, transform_indices = @transform_3, window_bounds = array<i64: 128, 128>}, {pipeline_mode = #tpu.pipeline_mode<synchronous>, transform_indices = @transform_4, window_bounds = array<i64: 1, 128>}, {transform_indices = @transform_5, window_bounds = array<i64: 128, 128>}, {transform_indices = @transform_6, window_bounds = array<i64: 128, 128>}]} {
    %c0 = arith.constant 0 : index
    %c0_0 = arith.constant 0 : index
    %0 = vector.load %arg1[%c0, %c0_0] : memref<128x128xf32, #tpu.memory_space<vmem>>, vector<128x128xf32>
    %1 = arith.truncf %0 : vector<128x128xf32> to vector<128x128xbf16>
    %c0_1 = arith.constant 0 : index
    %c0_2 = arith.constant 0 : index
    %2 = vector.load %arg2[%c0_1, %c0_2] : memref<128x128xbf16, #tpu.memory_space<vmem>>, vector<128x128xbf16>
    %cst = arith.constant dense<0.000000e+00> : vector<128x128xf32>
    %3 = tpu.matmul %1, %2, %cst {dimension_numbers = #tpu.dot_dimension_numbers<[1], [0], [0], [1], [0, 0, 1, 1], [], []>} : vector<128x128xbf16>, vector<128x128xbf16>, vector<128x128xf32> -> vector<128x128xf32>
    %c0_3 = arith.constant 0 : index
    %c0_4 = arith.constant 0 : index
    %4 = vector.load %arg3[%c0_3, %c0_4] : memref<1x128xf32, #tpu.memory_space<vmem>>, vector<1x128xf32>
    %5 = vector.broadcast %4 : vector<1x128xf32> to vector<128x128xf32>
    %6 = arith.addf %3, %5 : vector<128x128xf32>
    %7 = arith.truncf %6 : vector<128x128xf32> to vector<128x128xbf16>
    %c0_5 = arith.constant 0 : index
    %c0_6 = arith.constant 0 : index
    %8 = vector.load %arg6[%c0_5, %c0_6] : memref<128x128xbf16, #tpu.memory_space<vmem>>, vector<128x128xbf16>
    tpu.vector_store %arg6[%c0_5, %c0_6], %7 {strides = array<i32>} : memref<128x128xbf16, #tpu.memory_space<vmem>>, vector<128x128xbf16>,
    %c0_7 = arith.constant 0 : index
    %c0_8 = arith.constant 0 : index
    %9 = vector.load %arg4[%c0_7, %c0_8] : memref<128x128xbf16, #tpu.memory_space<vmem>>, vector<128x128xbf16>
    %cst_9 = arith.constant dense<0.000000e+00> : vector<128x128xf32>
    %10 = tpu.matmul %1, %9, %cst_9 {dimension_numbers = #tpu.dot_dimension_numbers<[1], [0], [0], [1], [0, 0, 1, 1], [], []>} : vector<128x128xbf16>, vector<128x128xbf16>, vector<128x128xf32> -> vector<128x128xf32>
    %c0_10 = arith.constant 0 : index
    %c0_11 = arith.constant 0 : index
    %11 = vector.load %arg5[%c0_10, %c0_11] : memref<1x128xf32, #tpu.memory_space<vmem>>, vector<1x128xf32>
    %12 = vector.broadcast %11 : vector<1x128xf32> to vector<128x128xf32>
    %13 = arith.addf %10, %12 : vector<128x128xf32>
    %14 = arith.truncf %13 : vector<128x128xf32> to vector<128x128xbf16>
    %c0_12 = arith.constant 0 : index
    %c0_13 = arith.constant 0 : index
    %15 = vector.load %arg7[%c0_12, %c0_13] : memref<128x128xbf16, #tpu.memory_space<vmem>>, vector<128x128xbf16>
    tpu.vector_store %arg7[%c0_12, %c0_13], %14 {strides = array<i32>} : memref<128x128xbf16, #tpu.memory_space<vmem>>, vector<128x128xbf16>,
    return
  }
  func.func @transform_0(%arg0: i32) -> (i32, i32) {
    %c0_i32 = arith.constant 0 : i32
    %c0_i32_0 = arith.constant 0 : i32
    return %arg0, %c0_i32 : i32, i32
  }
  func.func @transform_1(%arg0: i32) -> (i32, i32) {
    %c0_i32 = arith.constant 0 : i32
    %c0_i32_0 = arith.constant 0 : i32
    %c0_i32_1 = arith.constant 0 : i32
    return %c0_i32, %c0_i32_0 : i32, i32
  }
  func.func @transform_2(%arg0: i32) -> (i32, i32) {
    %c0_i32 = arith.constant 0 : i32
    %c0_i32_0 = arith.constant 0 : i32
    %c0_i32_1 = arith.constant 0 : i32
    return %c0_i32, %c0_i32_0 : i32, i32
  }
  func.func @transform_3(%arg0: i32) -> (i32, i32) {
    %c0_i32 = arith.constant 0 : i32
    %c0_i32_0 = arith.constant 0 : i32
    %c0_i32_1 = arith.constant 0 : i32
    return %c0_i32, %c0_i32_0 : i32, i32
  }
  func.func @transform_4(%arg0: i32) -> (i32, i32) {
    %c0_i32 = arith.constant 0 : i32
    %c0_i32_0 = arith.constant 0 : i32
    %c0_i32_1 = arith.constant 0 : i32
    return %c0_i32, %c0_i32_0 : i32, i32
  }
  func.func @transform_5(%arg0: i32) -> (i32, i32) {
    %c0_i32 = arith.constant 0 : i32
    %c0_i32_0 = arith.constant 0 : i32
    return %arg0, %c0_i32 : i32, i32
  }
  func.func @transform_6(%arg0: i32) -> (i32, i32) {
    %c0_i32 = arith.constant 0 : i32
    %c0_i32_0 = arith.constant 0 : i32
    return %arg0, %c0_i32 : i32, i32
  }
}

</mosaic_0001>

<bundles_post_ra>
// kernel: tpu_custom_call.1
= control target key start
LH: loop header
LB: loop body
LE: loop exit
PB: predicated region body
PF: predicated region fallthrough
CT: control target
= control target key end

     0   :  { %12 = vsyncpa [#allocation3], 0  ;;  %s1974_s0 = inlined_call_operand.hbm [shape: f32[256,128], index: 0, kind: input, shape index: {}]   ;;  %s1975_s1 = inlined_call_operand.hbm [shape: bf16[128,128], index: 1, kind: input, shape index: {}]   ;;  %s1976_s2 = inlined_call_operand.vmem [shape: f32[1,128], index: 2, kind: input, shape index: {}]   ;;  %s1977_s3 = inlined_call_operand.hbm [shape: bf16[128,128], index: 3, kind: input, shape index: {}]   ;;  %s1978_s4 = inlined_call_operand.vmem [shape: f32[1,128], index: 4, kind: input, shape index: {}]   ;;  %s1979_s5 = inlined_call_operand.hbm [shape: bf16[256,128], index: 5, kind: output, shape index: {0}]   ;;  %s1980_s6 = inlined_call_operand.hbm [shape: bf16[256,128], index: 6, kind: output, shape index: {1}]  }
   0x1   :  { %14 = vsyncpa [#allocation3 + $0x1], 0 }
   0x2   :  { %15 = vsyncpa [#allocation6], 0 }
   0x3   :  { %16 = vsyncpa [#allocation4], 0 }
   0x4   :  { %18 = vsyncpa [#allocation4 + $0x1], 0 }
   0x5   :  { %19 = vsyncpa [#allocation10], 0 }
   0x6   :  { %21 = vsyncpa [#allocation10 + $0x1], 0  ;;  %s1620_s21 = smov 0   ;;  %s1622_s22 = smov 0  }
   0x7   :  { %s1624_s23 = smov 0   ;;  %s1626_s24 = smov 0  }
   0x8 LB: > { %s1641_s25 = sadd.s32 4294967295, %s1572_s24   ;;  %s993_s26 = sadd.s32 4294967294, %s1572_s24   ;;  %s1572_s24 = sphi %s1626_s24, %s2000_s24   ;;  %s1568_s23 = sphi %s1624_s23, %s1999_s23   ;;  %s1564_s22 = sphi %s1622_s22, %s1998_s22   ;;  %s1560_s21 = sphi %s1620_s21, %s1997_s21  }
   0x9   : > { %p47_p0 = scmp.ne.s32.totalorder %s1564_s22, %s1560_s21  ;;  %p1981_p1 = scmp.eq.s32.totalorder %s1641_s25, 0 }
   0xa   : > { %p161_p3 = scmp.eq.s32.totalorder %s993_s26, 1  ;;  %p994_p5 = scmp.ge.s32.totalorder %s1572_s24, 1 }
   0xb   : > { %p1650_p4 = por %p1981_p1, %p47_p0  ;;  %p194_p7 = scmp.lt.s32.totalorder %s1572_s24, 3 }
   0xc   : > { %p1655_p6 = por %p161_p3, %p47_p0  ;;  %s1574_s30 = smov [#allocation5]  }
   0xd   : > { %s1984_s27 = scalar_select %p1650_p4, 1, 0 }
   0xe   : > { %s1985_s28 = scalar_select %p1655_p6, 1, 0 }
   0xf   : > { %p1660_p8 = pnand %p994_p5, %p194_p7  ;;  %s206_s7 = sshll.u32 %s1574_s30, 4  ;;  %s1664_s7 = int_to_ptr.vmem [resolvable:$true] %s206_s7 }
  0x10   : > { %s1575_s9 = smov [#allocation7]   ;;  %s1384_s13 = scalar_lea.hbm %s1975_s1, 1024 }
  0x11   : > { %p1304_p9 = pneg %p1660_p8  ;;  %s222_s10 = sshll.u32 %s1575_s9, 4  ;;  %s1675_s10 = int_to_ptr.vmem [resolvable:$true] %s222_s10 }
  0x12   : > { %p1385_p12 = scmp.ne.s32.totalorder %s1975_s1, %s1384_s13  ;;  %p1391_p5 = scmp.lt.u32.totalorder %s1384_s13, %s1975_s1 }
  0x13   : > { %p1671_p11 = pnand %p1304_p9, %p1981_p1 }
  0x15   : > { %p1386_p13 = pneg %p1671_p11 }
  0x17   : > { %p1387_p0 = pnand %p1386_p13, %p1385_p12 }
  0x19   : > { %p1388_p3 = pneg %p1387_p0 }
  0x1b   : > { %p1393_p7 = pnand %p1391_p5, %p1388_p3 }
  0x1d   : > { %1396 = shalt.err (!%p1393_p7)
}
  0x1e   : > { %s1397_s18 = scalar_lea.vmem %s1664_s7, 1024  ;;  %p1405_p2 = scmp.lt.s32.totalorder %s1664_s7, %s1664_s7 }
  0x1f   : > { %p1398_p9 = scmp.ne.s32.totalorder %s1664_s7, %s1397_s18  ;;  %p1406_p12 = scmp.lt.s32.totalorder %s1397_s18, %s1397_s18 }
  0x21   : > { %p1400_p10 = pnand %p1398_p9, %p1386_p13  ;;  %p1407_p0 = por %p1406_p12, %p1405_p2 }
  0x23   : > { %p1401_p1 = pneg %p1400_p10 }
  0x25   : > { %p1408_p6 = pnand %p1407_p0, %p1401_p1 }
  0x27   : > { %1411 = shalt.err (!%p1408_p6)
}
  0x28   : > { %s1576_s19 = smov 64   ;;  %s1577_s20 = smov 4  }
  0x29   : > { %1307 = dma.hbm_to_vmem [thread:$0]  (!%p1671_p11), %s1975_s1, 1024, %s1664_s7, [#allocation6], %s1576_s19, %s1576_s19, %s1577_s20  }
  0x2a   : > { %s1412_s12 = scalar_lea.hbm %s1977_s3, 1024 }
  0x2b   : > { %p1413_p2 = scmp.ne.s32.totalorder %s1977_s3, %s1412_s12  ;;  %p1419_p10 = scmp.lt.u32.totalorder %s1412_s12, %s1977_s3 }
  0x2d   : > { %p1415_p1 = pnand %p1413_p2, %p1386_p13 }
  0x2f   : > { %p1416_p6 = pneg %p1415_p1 }
  0x31   : > { %p1421_p3 = pnand %p1419_p10, %p1416_p6 }
  0x33   : > { %1424 = shalt.err (!%p1421_p3)
}
  0x34   : > { %s1425_s7 = scalar_lea.vmem %s1675_s10, 1024  ;;  %p1433_p12 = scmp.lt.s32.totalorder %s1675_s10, %s1675_s10 }
  0x35   : > { %p1426_p5 = scmp.ne.s32.totalorder %s1675_s10, %s1425_s7  ;;  %p1434_p0 = scmp.lt.s32.totalorder %s1425_s7, %s1425_s7 }
  0x37   : > { %p1428_p7 = pnand %p1426_p5, %p1386_p13  ;;  %p1435_p2 = por %p1434_p0, %p1433_p12 }
  0x39   : > { %p1429_p9 = pneg %p1428_p7 }
  0x3b   : > { %p1436_p1 = pnand %p1435_p2, %p1429_p9 }
  0x3d   : > { %1439 = shalt.err (!%p1436_p1)
}
  0x3e   : > { %1310 = dma.hbm_to_vmem [thread:$0]  (!%p1671_p11), %s1977_s3, 1024, %s1675_s10, [#allocation6], %s1576_s19, %s1576_s19, %s1577_s20  }
  0x3f   : > { %s1730_s26 = sadd.s32 1, %s1572_s24   ;;  %s34_s8 = sadd.s32 1, %s1568_s23 }
  0x40   : > { %s31_s30 = ssub.s32 %s1572_s24, %s1730_s26  ;;  %p41_p13 = scmp.ne.s32.totalorder %s1568_s23, %s1564_s22 }
  0x41   : > { %p32_p6 = scmp.eq.s32.totalorder %s31_s30, 0  ;;  %p42_p10 = scmp.eq.s32.totalorder %s1572_s24, 0 }
  0x42   : > { %p1988_p3 = scmp.eq.s32.totalorder %s1641_s25, 1  ;;  %p1324_p7 = scmp.lt.s32.totalorder %s1572_s24, 2 }
  0x43   : > { %s1746_s11 = scalar_select %p32_p6, %s1568_s23, %s34_s8  }
  0x44   : > { %p1740_p5 = por %p1988_p3, %p41_p13  ;;  %p43_p9 = por %p42_p10, %p41_p13 }
  0x45   : > { %s239_s12 = sand.u32 1, %s1568_s23   ;;  %s1065_s10 = sshll.u32 %s1572_s24, 11 }
  0x46   : > { %s1989_s9 = scalar_select %p1740_p5, 1, 0 }
  0x47   : > { %s998_s13 = sshll.u32 %s239_s12, 7  ;;  %s1753_s14 = scalar_lea.hbm %s1974_s0, %s1065_s10 }
  0x48   : > { %s243_s15 = scalar_lea.vmem [#allocation2], %s998_s13  ;;  %p1757_p11 = pnand %p1324_p7, %p43_p9 }
  0x49   : > { %s250_s16 = sshll.u32 %s243_s15, 4  ;;  %s1761_s17 = scalar_lea.sflag [#allocation3], %s239_s12  ;;  %s1755_s16 = int_to_ptr.vmem [resolvable:$true] %s250_s16 }
  0x4a   : > { %s1440_s18 = scalar_lea.hbm %s1753_s14, 2048  ;;  %p1442_p0 = pneg %p1757_p11 }
  0x4b   : > { %p1441_p12 = scmp.ne.s32.totalorder %s1753_s14, %s1440_s18  ;;  %s1445_s13 = scalar_lea.hbm %s1974_s0, 4096 }
  0x4c   : > { %p1446_p13 = scmp.lt.u32.totalorder %s1753_s14, %s1974_s0  ;;  %p1447_p6 = scmp.lt.u32.totalorder %s1445_s13, %s1440_s18 }
  0x4d   : > { %p1443_p2 = pnand %p1442_p0, %p1441_p12  ;;  %p1449_p3 = scmp.lt.u32.totalorder %s1440_s18, %s1753_s14 }
  0x4e   : > { %p1448_p10 = por %p1447_p6, %p1446_p13 }
  0x4f   : > { %p1444_p1 = pneg %p1443_p2 }
  0x50   : > { %p1450_p7 = por %p1449_p3, %p1448_p10 }
  0x52   : > { %p1451_p9 = pnand %p1450_p7, %p1444_p1 }
  0x54   : > { %1454 = shalt.err (!%p1451_p9)
}
  0x55   : > { %s1455_s12 = scalar_lea.vmem %s1755_s16, 2048  ;;  %s1578_s20 = smov [#allocation2]  }
  0x56   : > { %p1456_p12 = scmp.ne.s32.totalorder %s1755_s16, %s1455_s12  ;;  %s1460_s15 = sshll.u32 %s1578_s20, 4  ;;  %s1461_s15 = int_to_ptr.vmem [resolvable:$false] %s1460_s15 }
  0x57   : > { %s1462_s8 = scalar_lea.vmem %s1461_s15, 4096  ;;  %p1463_p4 = scmp.lt.s32.totalorder %s1755_s16, %s1461_s15 }
  0x58   : > { %p1458_p2 = pnand %p1456_p12, %p1442_p0  ;;  %p1464_p13 = scmp.lt.s32.totalorder %s1462_s8, %s1455_s12 }
  0x5a   : > { %p1459_p5 = pneg %p1458_p2  ;;  %p1465_p6 = por %p1464_p13, %p1463_p4 }
  0x5c   : > { %p1466_p10 = pnand %p1465_p6, %p1459_p5 }
  0x5e   : > { %1469 = shalt.err (!%p1466_p10)
}
  0x5f   : > { %s1579_s18 = smov 128   ;;  %s1580_s30 = smov 8  }
  0x60   : > { %1314 = dma.hbm_to_vmem [thread:$0]  (!%p1757_p11), %s1753_s14, 2048, %s1755_s16, %s1761_s17, %s1579_s18, %s1579_s18, %s1580_s30  }
  0x61   : > { %262 = sbr.rel (%p1660_p8) target bundleno = 423 (0x1a7), region = 40  ;;  %s1792_s13 = sand.u32 (!%p1660_p8), 1, %s1564_s22  }
  0x62   : > { %s1002_s10 = sshll.u32 (!%p1660_p8), %s1792_s13, 7  ;;  %s265_s19 = scalar_lea.sflag (!%p1660_p8), [#allocation3], %s1792_s13 }
  0x63   : > { %s1796_s12 = scalar_lea.vmem (!%p1660_p8), [#allocation2], %s1002_s10  ;;  %p1991_p4 = scmp.ne.s32.totalorder (!%p1660_p8), %s1984_s27, 0 }
  0x68   : > { %1543 = dma.done.wait (%p1991_p4), %s265_s19, 2048  }
  0x69   : > { %1545 = vsyncadd (%p1991_p4), %s265_s19, 4294965248  ;;  %p1992_p5 = scmp.eq.s32.totalorder %s1641_s25, 0 }
  0x6b   : > { %1547 = dma.done.wait (%p1992_p5), [#allocation6], 2048   ;;  %p1993_p8 = pmov %p1992_p5 }
  0x6c   : > { %v1368_v0 = vld [vmem:[#allocation5] sm:$0xff]   ;;  %v1370_v2 = vld [vmem:[#allocation5 + $0x8] sm:$0xff]   ;;  %v1372_v4 = vld [vmem:[#allocation5 + $0x10] sm:$0xff]   ;;  %s1005_s7 = sshll.u32 %s1792_s13, 6  ;;  %s1098_s18 = sshll.u32 %s1641_s25, 10 }
  0x6d   : > { %1549 = vsyncadd (%p1993_p8), [#allocation6], 4294965248  ;;  %v1369_v1 = vld [vmem:[#allocation7] sm:$0xff]   ;;  %1226 = vmatprep.subr.bf16.mxu0 %v1368_v0  ;;  %v1371_v3 = vld [vmem:[#allocation7 + $0x8] sm:$0xff]   ;;  %s1841_s17 = scalar_lea.vmem [#allocation8], %s1005_s7  ;;  %s1844_s20 = scalar_lea.vmem [#allocation9], %s1005_s7 }
  0x6e   : > { %1258 = vmatprep.subr.bf16.mxu1 %v1369_v1  ;;  %1227 = vmatpush3.bf16.msra.mxu0 %v1368_v0  ;;  %v1373_v5 = vld [vmem:[#allocation7 + $0x10] sm:$0xff]   ;;  %v1374_v6 = vld [vmem:[#allocation5 + $0x18] sm:$0xff]   ;;  %v1376_v8 = vld [vmem:[#allocation5 + $0x20] sm:$0xff]   ;;  %s853_s15 = sshll.u32 %s1841_s17, 4  ;;  %s869_s8 = sshll.u32 %s1844_s20, 4  ;;  %s1878_s15 = int_to_ptr.vmem [resolvable:$true] %s853_s15  ;;  %s1880_s8 = int_to_ptr.vmem [resolvable:$true] %s869_s8 }
  0x6f   : > { %1259 = vmatpush3.bf16.msra.mxu1 %v1369_v1  ;;  %1228 = vmatprep.subr.bf16.mxu0 %v1370_v2  ;;  %v1375_v7 = vld [vmem:[#allocation7 + $0x18] sm:$0xff]   ;;  %v1377_v9 = vld [vmem:[#allocation7 + $0x20] sm:$0xff]   ;;  %v1378_v10 = vld [vmem:[#allocation5 + $0x28] sm:$0xff]   ;;  %s1891_s10 = scalar_lea.hbm %s1979_s5, %s1098_s18  ;;  %s1897_s27 = scalar_lea.hbm %s1980_s6, %s1098_s18 }
  0x70   : > { %1260 = vmatprep.subr.bf16.mxu1 %v1371_v3  ;;  %v314_v11 = vld [vmem:[%s1796_s12] sm:$0xff]  ;;  %v315_v12 = vld [vmem:[%s1796_s12 + $0x8] sm:$0xff]  ;;  %v1380_v15 = vld [vmem:[#allocation5 + $0x30] sm:$0xff]   ;;  %s835_s29 = scalar_lea.sflag [#allocation4], %s1792_s13  ;;  %s1470_s14 = scalar_lea.vmem %s1878_s15, 1024 }
  0x71   : > { %v1379_v13 = vld [vmem:[#allocation7 + $0x28] sm:$0xff]   ;;  %v330_v14 = vpack.c.bf16 %v315_v12, %v314_v11  ;;  %v1381_v16 = vld [vmem:[#allocation7 + $0x30] sm:$0xff]   ;;  %v1382_v17 = vld [vmem:[#allocation5 + $0x38] sm:$0xff]   ;;  %p1471_p11 = scmp.ne.s32.totalorder %s1878_s15, %s1470_s14  ;;  %p1994_p0 = scmp.ne.s32.totalorder %s1989_s9, 0 }
  0x72   : > { %1229 = vmatpush3.bf16.msra.mxu0 %v1370_v2  ;;  %v1383_v18 = vld [vmem:[#allocation7 + $0x38] sm:$0xff]   ;;  %v316_v19 = vld [vmem:[%s1796_s12 + $0x10] sm:$0xff]  ;;  %v318_v21 = vld [vmem:[%s1796_s12 + $0x20] sm:$0xff]  ;;  %s1581_s16 = smov [#allocation8]  }
  0x73   : > { %1261 = vmatpush3.bf16.msra.mxu1 %v1371_v3  ;;  %1230 = vmatprep.subr.bf16.mxu0 %v1372_v4  ;;  %v317_v20 = vld [vmem:[%s1796_s12 + $0x18] sm:$0xff]  ;;  %v319_v22 = vld [vmem:[%s1796_s12 + $0x28] sm:$0xff]  ;;  %v320_v25 = vld [vmem:[%s1796_s12 + $0x30] sm:$0xff]  ;;  %p1472_p1 = pnand %p1471_p11, %p1994_p0  ;;  %s1474_s7 = sshll.u32 %s1581_s16, 4  ;;  %s1475_s7 = int_to_ptr.vmem [resolvable:$false] %s1474_s7 }
  0x74   : > { %1262 = vmatprep.subr.bf16.mxu1 %v1373_v5  ;;  %1242 = vmatprep.mubr.bf16.mxu0 %v330_v14  ;;  %v331_v23 = vpack.c.bf16 %v317_v20, %v316_v19  ;;  %v332_v24 = vpack.c.bf16 %v319_v22, %v318_v21  ;;  %v321_v26 = vld [vmem:[%s1796_s12 + $0x38] sm:$0xff]  ;;  %v322_v27 = vld [vmem:[%s1796_s12 + $0x40] sm:$0xff]  ;;  %v323_v28 = vld [vmem:[%s1796_s12 + $0x48] sm:$0xff]  ;;  %s1476_s25 = scalar_lea.vmem %s1475_s7, 2048  ;;  %p1477_p7 = scmp.lt.s32.totalorder %s1878_s15, %s1475_s7 }
  0x75   : > { %1274 = vmatprep.mubr.bf16.mxu1 %v330_v14  ;;  %v333_v29 = vpack.c.bf16 %v321_v26, %v320_v25  ;;  %v334_v30 = vpack.c.bf16 %v323_v28, %v322_v27  ;;  %v324_v31 = vld [vmem:[%s1796_s12 + $0x50] sm:$0xff]  ;;  %v325_v32 = vld [vmem:[%s1796_s12 + $0x58] sm:$0xff]  ;;  %v326_v33 = vld [vmem:[%s1796_s12 + $0x60] sm:$0xff]  ;;  %p1473_p3 = pneg %p1472_p1  ;;  %p1478_p9 = scmp.lt.s32.totalorder %s1476_s25, %s1470_s14 }
  0x76   : > { %1231 = vmatpush3.bf16.msra.mxu0 %v1372_v4  ;;  %v327_v34 = vld [vmem:[%s1796_s12 + $0x68] sm:$0xff]  ;;  %v335_v35 = vpack.c.bf16 %v325_v32, %v324_v31  ;;  %v328_v37 = vld [vmem:[%s1796_s12 + $0x70] sm:$0xff]  ;;  %v329_v38 = vld [vmem:[%s1796_s12 + $0x78] sm:$0xff] }
  0x77   : > { %1263 = vmatpush3.bf16.msra.mxu1 %v1373_v5  ;;  %1232 = vmatprep.subr.bf16.mxu0 %v1374_v6  ;;  %v336_v36 = vpack.c.bf16 %v327_v34, %v326_v33  ;;  %v337_v39 = vpack.c.bf16 %v329_v38, %v328_v37  ;;  %v1825_v41 = vld [vmem:[%s1976_s2] ss:$0 sm:$0xff]  ;;  %p1479_p12 = por %p1478_p9, %p1477_p7 }
  0x78   : > { %1264 = vmatprep.subr.bf16.mxu1 %v1375_v7  ;;  %v1830_v43 = vld [vmem:[%s1978_s4] ss:$0 sm:$0xff] }
  0x79   : > { %p1480_p2 = pnand %p1479_p12, %p1473_p3 }
  0x7a   : > { %1233 = vmatpush3.bf16.msra.mxu0 %v1374_v6 }
  0x7b   : > { %1265 = vmatpush3.bf16.msra.mxu1 %v1375_v7  ;;  %1234 = vmatprep.subr.bf16.mxu0 %v1376_v8 }
  0x7c   : > { %1266 = vmatprep.subr.bf16.mxu1 %v1377_v9 }
  0x7e   : > { %1235 = vmatpush3.bf16.msra.mxu0 %v1376_v8 }
  0x7f   : > { %1267 = vmatpush3.bf16.msra.mxu1 %v1377_v9  ;;  %1236 = vmatprep.subr.bf16.mxu0 %v1378_v10 }
  0x80   : > { %1268 = vmatprep.subr.bf16.mxu1 %v1379_v13 }
  0x82   : > { %1237 = vmatpush3.bf16.msra.mxu0 %v1378_v10 }
  0x83   : > { %1269 = vmatpush3.bf16.msra.mxu1 %v1379_v13  ;;  %1238 = vmatprep.subr.bf16.mxu0 %v1380_v15 }
  0x84   : > { %1270 = vmatprep.subr.bf16.mxu1 %v1381_v16 }
  0x86   : > { %1239 = vmatpush3.bf16.msra.mxu0 %v1380_v15 }
  0x87   : > { %1271 = vmatpush3.bf16.msra.mxu1 %v1381_v16  ;;  %1240 = vmatprep.subr.bf16.mxu0 %v1382_v17 }
  0x88   : > { %1272 = vmatprep.subr.bf16.mxu1 %v1383_v18 }
  0x8a   : > { %1241 = vmatpush3.bf16.msra.mxu0 %v1382_v17 }
  0x8b   : > { %1273 = vmatpush3.bf16.msra.mxu1 %v1383_v18 }
  0x8d   : > { %1243 = vmatmul.mubr.bf16.vlgmr.msra.gmra.mrb[0].mxu0 %v331_v23 }
  0x8e   : > { %1275 = vmatmul.mubr.bf16.vlgmr.msra.gmra.mrb[0].mxu1 %v331_v23  ;;  %1246 = vmatprep.mubr.bf16.mxu0 %v332_v24 }
  0x8f   : > { %1278 = vmatprep.mubr.bf16.mxu1 %v332_v24 }
  0x95   : > { %1247 = vmatmul.mubr.bf16.gmra.mrb[4].mxu0 %v333_v29 }
  0x96   : > { %1279 = vmatmul.mubr.bf16.gmra.mrb[4].mxu1 %v333_v29  ;;  %1250 = vmatprep.mubr.bf16.mxu0 %v334_v30 }
  0x97   : > { %1282 = vmatprep.mubr.bf16.mxu1 %v334_v30 }
  0x9d   : > { %1251 = vmatmul.mubr.bf16.gmra.mrb[8].mxu0 %v335_v35 }
  0x9e   : > { %1283 = vmatmul.mubr.bf16.gmra.mrb[8].mxu1 %v335_v35  ;;  %1254 = vmatprep.mubr.bf16.mxu0 %v336_v36 }
  0x9f   : > { %1286 = vmatprep.mubr.bf16.mxu1 %v336_v36 }
  0xa5   : > { %1255 = vmatmul.mubr.bf16.gmra.mrb[12].mxu0 %v337_v39 }
  0xa6   : > { %1287 = vmatmul.mubr.bf16.gmra.mrb[12].mxu1 %v337_v39 }
 0x160   : > { %v1244_v40 = vpop.f32.mrb[0].mxu0 }
 0x161   : > { %v1276_v42 = vpop.f32.mrb[0].mxu1  ;;  %v443_v44 = vpop.f32.mrb[1].mxu0  ;;  %v452_v47 = vadd.f32 %v1244_v40, %v1825_v41 }
 0x162   : > { %v691_v45 = vpop.f32.mrb[1].mxu1  ;;  %v1245_v46 = vpop.f32.mrb[2].mxu0  ;;  %v700_v51 = vadd.f32 %v1276_v42, %v1830_v43  ;;  %v444_v52 = vadd.f32 %v1825_v41, %v443_v44 }
 0x163   : > { %v455_v48 = vadd.f32 %v1245_v46, %v1825_v41  ;;  %v1277_v49 = vpop.f32.mrb[2].mxu1  ;;  %v446_v50 = vpop.f32.mrb[3].mxu0  ;;  %v692_v56 = vadd.f32 %v1830_v43, %v691_v45 }
 0x164   : > { %v703_v53 = vadd.f32 %v1277_v49, %v1830_v43  ;;  %v447_v54 = vadd.f32 %v1825_v41, %v446_v50  ;;  %v694_v55 = vpop.f32.mrb[3].mxu1 }
 0x165   : > { %v1108_v57 = vpack.c.bf16 %v455_v48, %v452_v47  ;;  %v695_v58 = vadd.f32 %v1830_v43, %v694_v55 }
 0x166   : > { %v1148_v59 = vpack.c.bf16 %v703_v53, %v700_v51  ;;  %v1103_v60 = vpack.c.bf16 %v447_v54, %v444_v52 }
 0x167   : > { %1180 = vst [vmem:[%s1841_s17 + $0x8] sm:$0xff] %v1108_v57   ;;  %v1143_v61 = vpack.c.bf16 %v695_v58, %v692_v56 }
 0x168   : > { %1187 = vst [vmem:[%s1844_s20 + $0x8] sm:$0xff] %v1148_v59   ;;  %1104 = vst [vmem:[%s1841_s17] sm:$0xff] %v1103_v60   ;;  %v1248_v62 = vpop.f32.mrb[4].mxu0 }
 0x169   : > { %1144 = vst [vmem:[%s1844_s20] sm:$0xff] %v1143_v61   ;;  %v1280_v63 = vpop.f32.mrb[4].mxu1  ;;  %v459_v0 = vpop.f32.mrb[5].mxu0  ;;  %v468_v3 = vadd.f32 %v1248_v62, %v1825_v41 }
 0x16a   : > { %v707_v1 = vpop.f32.mrb[5].mxu1  ;;  %v1249_v2 = vpop.f32.mrb[6].mxu0  ;;  %v716_v7 = vadd.f32 %v1280_v63, %v1830_v43  ;;  %v460_v8 = vadd.f32 %v1825_v41, %v459_v0 }
 0x16b   : > { %v471_v4 = vadd.f32 %v1249_v2, %v1825_v41  ;;  %v1281_v5 = vpop.f32.mrb[6].mxu1  ;;  %v462_v6 = vpop.f32.mrb[7].mxu0  ;;  %v708_v12 = vadd.f32 %v1830_v43, %v707_v1 }
 0x16c   : > { %v719_v9 = vadd.f32 %v1281_v5, %v1830_v43  ;;  %v463_v10 = vadd.f32 %v1825_v41, %v462_v6  ;;  %v710_v11 = vpop.f32.mrb[7].mxu1 }
 0x16d   : > { %v1118_v13 = vpack.c.bf16 %v471_v4, %v468_v3  ;;  %v711_v14 = vadd.f32 %v1830_v43, %v710_v11 }
 0x16e   : > { %v1158_v15 = vpack.c.bf16 %v719_v9, %v716_v7  ;;  %v1113_v16 = vpack.c.bf16 %v463_v10, %v460_v8 }
 0x16f   : > { %1182 = vst [vmem:[%s1841_s17 + $0x18] sm:$0xff] %v1118_v13   ;;  %v1153_v17 = vpack.c.bf16 %v711_v14, %v708_v12 }
 0x170   : > { %1189 = vst [vmem:[%s1844_s20 + $0x18] sm:$0xff] %v1158_v15   ;;  %1181 = vst [vmem:[%s1841_s17 + $0x10] sm:$0xff] %v1113_v16   ;;  %v1252_v18 = vpop.f32.mrb[8].mxu0 }
 0x171   : > { %1188 = vst [vmem:[%s1844_s20 + $0x10] sm:$0xff] %v1153_v17   ;;  %v1284_v19 = vpop.f32.mrb[8].mxu1  ;;  %v475_v20 = vpop.f32.mrb[9].mxu0  ;;  %v484_v23 = vadd.f32 %v1252_v18, %v1825_v41 }
 0x172   : > { %v723_v21 = vpop.f32.mrb[9].mxu1  ;;  %v1253_v22 = vpop.f32.mrb[10].mxu0  ;;  %v732_v27 = vadd.f32 %v1284_v19, %v1830_v43  ;;  %v476_v28 = vadd.f32 %v1825_v41, %v475_v20 }
 0x173   : > { %v487_v24 = vadd.f32 %v1253_v22, %v1825_v41  ;;  %v1285_v25 = vpop.f32.mrb[10].mxu1  ;;  %v478_v26 = vpop.f32.mrb[11].mxu0  ;;  %v724_v32 = vadd.f32 %v1830_v43, %v723_v21 }
 0x174   : > { %v735_v29 = vadd.f32 %v1285_v25, %v1830_v43  ;;  %v479_v30 = vadd.f32 %v1825_v41, %v478_v26  ;;  %v726_v31 = vpop.f32.mrb[11].mxu1 }
 0x175   : > { %v1128_v33 = vpack.c.bf16 %v487_v24, %v484_v23  ;;  %v727_v34 = vadd.f32 %v1830_v43, %v726_v31 }
 0x176   : > { %v1168_v35 = vpack.c.bf16 %v735_v29, %v732_v27  ;;  %v1123_v36 = vpack.c.bf16 %v479_v30, %v476_v28 }
 0x177   : > { %1184 = vst [vmem:[%s1841_s17 + $0x28] sm:$0xff] %v1128_v33   ;;  %v1163_v37 = vpack.c.bf16 %v727_v34, %v724_v32 }
 0x178   : > { %1191 = vst [vmem:[%s1844_s20 + $0x28] sm:$0xff] %v1168_v35   ;;  %1183 = vst [vmem:[%s1841_s17 + $0x20] sm:$0xff] %v1123_v36   ;;  %v1256_v38 = vpop.f32.mrb[12].mxu0 }
 0x179   : > { %1190 = vst [vmem:[%s1844_s20 + $0x20] sm:$0xff] %v1163_v37   ;;  %v1288_v39 = vpop.f32.mrb[12].mxu1  ;;  %v491_v40 = vpop.f32.mrb[13].mxu0  ;;  %v500_v45 = vadd.f32 %v1256_v38, %v1825_v41 }
 0x17a   : > { %v739_v42 = vpop.f32.mrb[13].mxu1  ;;  %v1257_v44 = vpop.f32.mrb[14].mxu0  ;;  %v748_v49 = vadd.f32 %v1288_v39, %v1830_v43  ;;  %v492_v50 = vadd.f32 %v1825_v41, %v491_v40 }
 0x17b   : > { %v503_v46 = vadd.f32 %v1257_v44, %v1825_v41  ;;  %v1289_v47 = vpop.f32.mrb[14].mxu1  ;;  %v494_v48 = vpop.f32.mrb[15].mxu0  ;;  %v740_v54 = vadd.f32 %v1830_v43, %v739_v42 }
 0x17c   : > { %v751_v51 = vadd.f32 %v1289_v47, %v1830_v43  ;;  %v495_v52 = vadd.f32 %v1825_v41, %v494_v48  ;;  %v742_v53 = vpop.f32.mrb[15].mxu1 }
 0x17d   : > { %v1138_v55 = vpack.c.bf16 %v503_v46, %v500_v45  ;;  %v743_v56 = vadd.f32 %v1830_v43, %v742_v53 }
 0x17e   : > { %v1178_v57 = vpack.c.bf16 %v751_v51, %v748_v49  ;;  %v1133_v58 = vpack.c.bf16 %v495_v52, %v492_v50 }
 0x17f   : > { %1186 = vst [vmem:[%s1841_s17 + $0x38] sm:$0xff] %v1138_v55   ;;  %v1173_v59 = vpack.c.bf16 %v743_v56, %v740_v54 }
 0x180   : > { %1193 = vst [vmem:[%s1844_s20 + $0x38] sm:$0xff] %v1178_v57   ;;  %1185 = vst [vmem:[%s1841_s17 + $0x30] sm:$0xff] %v1133_v58  }
 0x181   : > { %1192 = vst [vmem:[%s1844_s20 + $0x30] sm:$0xff] %v1173_v59  }
 0x182   : > { %1483 = shalt.err (!%p1480_p2)
}
 0x183   : > { %s1484_s17 = scalar_lea.hbm %s1891_s10, 1024  ;;  %s1488_s30 = scalar_lea.hbm %s1979_s5, 2048 }
 0x184   : > { %p1485_p13 = scmp.ne.s32.totalorder %s1891_s10, %s1484_s17  ;;  %p1489_p4 = scmp.lt.u32.totalorder %s1891_s10, %s1979_s5 }
 0x185   : > { %p1490_p5 = scmp.lt.u32.totalorder %s1488_s30, %s1484_s17  ;;  %p1492_p11 = scmp.lt.u32.totalorder %s1484_s17, %s1891_s10 }
 0x186   : > { %p1486_p6 = pnand %p1485_p13, %p1994_p0 }
 0x187   : > { %p1491_p8 = por %p1490_p5, %p1489_p4 }
 0x188   : > { %p1487_p10 = pneg %p1486_p6 }
 0x189   : > { %p1493_p1 = por %p1492_p11, %p1491_p8 }
 0x18b   : > { %p1494_p3 = pnand %p1493_p1, %p1487_p10 }
 0x18d   : > { %1497 = shalt.err (!%p1494_p3)
}
 0x18e   : > { %s1582_s14 = smov 64   ;;  %s1583_s16 = smov 4  }
 0x18f   : > { %1300 = dma.vmem_to_hbm [thread:$0]  (%p1994_p0), %s1878_s15, 1024, %s1891_s10, %s835_s29, %s1582_s14, %s1582_s14, %s1583_s16  }
 0x190   : > { %s840_s7 = scalar_lea.sflag [#allocation10], %s1792_s13  ;;  %s1498_s25 = scalar_lea.vmem %s1880_s8, 1024 }
 0x191   : > { %p1499_p7 = scmp.ne.s32.totalorder %s1880_s8, %s1498_s25  ;;  %s1584_s17 = smov [#allocation9]  }
 0x192   : > { %s1502_s20 = sshll.u32 %s1584_s17, 4  ;;  %s1503_s20 = int_to_ptr.vmem [resolvable:$false] %s1502_s20 }
 0x193   : > { %p1500_p9 = pnand %p1499_p7, %p1994_p0  ;;  %s1504_s18 = scalar_lea.vmem %s1503_s20, 2048 }
 0x194   : > { %p1505_p2 = scmp.lt.s32.totalorder %s1880_s8, %s1503_s20  ;;  %p1506_p13 = scmp.lt.s32.totalorder %s1504_s18, %s1498_s25 }
 0x195   : > { %p1501_p12 = pneg %p1500_p9 }
 0x196   : > { %p1507_p6 = por %p1506_p13, %p1505_p2 }
 0x198   : > { %p1508_p10 = pnand %p1507_p6, %p1501_p12 }
 0x19a   : > { %1511 = shalt.err (!%p1508_p10)
}
 0x19b   : > { %s1512_s15 = scalar_lea.hbm %s1897_s27, 1024  ;;  %s1516_s30 = scalar_lea.hbm %s1980_s6, 2048 }
 0x19c   : > { %p1513_p4 = scmp.ne.s32.totalorder %s1897_s27, %s1512_s15  ;;  %p1517_p11 = scmp.lt.u32.totalorder %s1897_s27, %s1980_s6 }
 0x19d   : > { %p1518_p1 = scmp.lt.u32.totalorder %s1516_s30, %s1512_s15  ;;  %p1520_p7 = scmp.lt.u32.totalorder %s1512_s15, %s1897_s27 }
 0x19e   : > { %p1514_p5 = pnand %p1513_p4, %p1994_p0 }
 0x19f   : > { %p1519_p3 = por %p1518_p1, %p1517_p11 }
 0x1a0   : > { %p1515_p8 = pneg %p1514_p5 }
 0x1a1   : > { %p1521_p9 = por %p1520_p7, %p1519_p3 }
 0x1a3   : > { %p1522_p12 = pnand %p1521_p9, %p1515_p8 }
 0x1a5   : > { %1525 = shalt.err (!%p1522_p12)
}
 0x1a6   : > { %1301 = dma.vmem_to_hbm [thread:$0]  (%p1994_p0), %s1880_s8, 1024, %s1897_s27, %s840_s7, %s1582_s14, %s1582_s14, %s1583_s16  }
 0x1a7 PF: > { %s884_s25 = sand.u32 1, %s1560_s21   ;;  %p1995_p2 = scmp.ne.s32.totalorder %s1985_s28, 0 }
 0x1a8   : > { %p1996_p13 = scmp.ge.s32.totalorder %s1572_s24, 2  ;;  %s885_s17 = scalar_lea.sflag [#allocation4], %s884_s25 }
 0x1aa   : > { %p1316_p6 = pnand %p1996_p13, %p1995_p2 }
 0x1ac   : > { %1551 = dma.done.wait (!%p1316_p6), %s885_s17, 1024  }
 0x1ad   : > { %1553 = vsyncadd (!%p1316_p6), %s885_s17, 4294966272  ;;  %s894_s9 = scalar_lea.sflag [#allocation10], %s884_s25 }
 0x1ae   : > { %1555 = dma.done.wait (!%p1316_p6), %s894_s9, 1024  }
 0x1af   : > { %1557 = vsyncadd (!%p1316_p6), %s894_s9, 4294966272  ;;  %p24_p0 = scmp.ge.s32.totalorder %s1730_s26, 4   ;;  %s1997_s21 = smov %s1564_s22 }
 0x1b0   : > { %s1998_s22 = smov %s1568_s23  ;;  %s1999_s23 = smov %s1746_s11 }
 0x1b1   : > { %s2000_s24 = smov %s1730_s26  ;;  %26 = sbr.rel (!%p24_p0) target bundleno = 8 (0x8), region = 110 }
 0x1b8   :  { %899 = vsyncpa [#allocation3], 1 }
 0x1b9   :  { %901 = vsyncpa [#allocation3 + $0x1], 1 }
 0x1ba   :  { %902 = vsyncpa [#allocation6], 1 }
 0x1bb   :  { %903 = vsyncpa [#allocation4], 1 }
 0x1bc   :  { %905 = vsyncpa [#allocation4 + $0x1], 1 }
 0x1bd   :  { %906 = vsyncpa [#allocation10], 1 }
 0x1be   :  { %908 = vsyncpa [#allocation10 + $0x1], 1 }

</bundles_post_ra>
